<compile_context>
chip_gen: v7x
topology: tpu7x:2x2x1
jax: 0.10.0
libtpu: 0.0.40
codegen_flags: <defaults>
</compile_context>

<pallas_src>
from functools import partial

import jax
import jax.numpy as jnp
from jax.experimental import pallas as pl
from jax.experimental.pallas import tpu as pltpu


def _attn_dropout_kernel(q_ref, k_ref, v_ref, bits_ref, o_ref, *,
                         scale, threshold, inv_keep):
    # q: (Bt, Lq, D), k: (Bt, Lk, D), v: (Bt, Lk, Dv), bits: (Bt, Lq, Lk)
    q = q_ref[...]
    k = k_ref[...]
    v = v_ref[...]

    # scores = q @ k^T (batched), MXU fed with the input dtype (bf16 stays bf16),
    # accumulation in f32.
    s = jnp.einsum("bqd,bkd->bqk", q, k,
                   preferred_element_type=jnp.float32)        # (Bt, Lq, Lk) f32
    s = s * scale                                             # static scalar

    # numerically-stable softmax over the last dim
    m = jnp.max(s, axis=-1, keepdims=True)
    e = jnp.exp(s - m)
    denom = jnp.sum(e, axis=-1, keepdims=True)
    sm = e / denom

    # dropout: keep iff bits >= threshold  (bits uniform in [0, 2^24),
    # threshold = round(p * 2^24)); survivors scaled by 1/(1-p).
    # p == 1 -> threshold == 2^24 -> everything dropped (exact zeros),
    # p == 0 -> threshold == 0, inv_keep == 1 -> identity.
    keep = bits_ref[...] >= threshold
    dropped = jnp.where(keep, sm * inv_keep, 0.0)

    # output = dropout(softmax) @ value, second matmul fed in value's dtype.
    out = jnp.einsum("bqk,bkd->bqd", dropped.astype(v.dtype), v,
                     preferred_element_type=jnp.float32)      # (Bt, Lq, Dv)
    o_ref[...] = out.astype(o_ref.dtype)


def sdp_attention_dropout(query, key, value, scale_factor, dropout_p,
                          seed=0, block_b=8):
    B, Lq, D = query.shape
    Bk, Lk, Dk = key.shape
    Bv, Lkv, Dv = value.shape
    assert B == Bk == Bv and D == Dk and Lk == Lkv

    # scale / dropout_p are treated as static hyperparameters (baked in at trace
    # time), so they cost nothing per element inside the kernel.
    p = min(max(float(dropout_p), 0.0), 1.0)
    scale = float(scale_factor)
    threshold = min(int(round(p * (1 << 24))), 1 << 24)
    inv_keep = 0.0 if p >= 1.0 else 1.0 / (1.0 - p)

    # batch blocking: Bt batch elements per grid step (amortizes per-step
    # pipeline overhead, denser DMAs / stores than 1 batch per step).
    bt = max(1, min(int(block_b), B))
    nb = pl.cdiv(B, bt)

    # precomputed dropout randomness: int32 uniform in [0, 2^24), one value per
    # score element -> mask is independent of any tiling choice.
    bits = jax.random.randint(jax.random.PRNGKey(seed), (B, Lq, Lk),
                              0, 1 << 24, dtype=jnp.int32)

    kernel = partial(_attn_dropout_kernel, scale=scale, threshold=threshold,
                     inv_keep=inv_keep)

    return pl.pallas_call(
        kernel,
        out_shape=jax.ShapeDtypeStruct((B, Lq, Dv), query.dtype),
        grid=(nb,),
        in_specs=[
            pl.BlockSpec((bt, Lq, D),  lambda b: (b, 0, 0)),   # query
            pl.BlockSpec((bt, Lk, D),  lambda b: (b, 0, 0)),   # key
            pl.BlockSpec((bt, Lk, Dv), lambda b: (b, 0, 0)),   # value
            pl.BlockSpec((bt, Lq, Lk), lambda b: (b, 0, 0)),   # dropout bits
        ],
        out_specs=pl.BlockSpec((bt, Lq, Dv), lambda b: (b, 0, 0)),
        compiler_params=pltpu.CompilerParams(
            dimension_semantics=("parallel",)),
    )(query, key, value, bits)


def _reference(q, k, v, scale_factor):
    # pure-JAX reference for the p == 0 (no-dropout) path
    s = jnp.einsum("bqd,bkd->bqk",
                   q.astype(jnp.float32), k.astype(jnp.float32)) * float(scale_factor)
    sm = jax.nn.softmax(s, axis=-1)
    return jnp.einsum("bqk,bkd->bqd", sm, v.astype(jnp.float32)).astype(q.dtype)


if __name__ == "__main__":
    # Shapes consistent with the module's forward:
    #   query (B, Lq, D), key (B, Lk, D), value (B, Lk, Dv)
    B, Lq, Lk, D, Dv = 2, 1, 10, 8, 8
    k0, k1, k2 = jax.random.split(jax.random.PRNGKey(0), 3)
    query = jax.random.normal(k0, (B, Lq, D), dtype=jnp.float32)
    key = jax.random.normal(k1, (B, Lk, D), dtype=jnp.float32)
    value = jax.random.normal(k2, (B, Lk, Dv), dtype=jnp.float32)

    scale_factor = 10.0   # torch.tensor(10) in the reference
    dropout_p = 1.0       # dropout_p = 1 in the reference -> output is all zeros

    out = sdp_attention_dropout(query, key, value, scale_factor, dropout_p, seed=0)
    out = jax.block_until_ready(out)
    assert out.shape == (B, Lq, Dv)
    # With p == 1, F.dropout zeros everything, so output must be exactly zero.
    assert bool(jnp.all(out == 0.0))

    # p == 0 path is deterministic -> must match a pure-JAX reference.
    out_p0 = sdp_attention_dropout(query, key, value, scale_factor, 0.0, seed=0)
    out_p0 = jax.block_until_ready(out_p0)
    ref = _reference(query, key, value, scale_factor)
    assert bool(jnp.allclose(out_p0, ref, atol=1e-5, rtol=1e-5))

    print("KERNEL_OK")
</pallas_src>

<mosaic_0001>
module attributes {stable_mosaic.version = 11 : i64} {
  func.func @_attn_dropout_kernel(%arg0: i32, %arg1: memref<2x1x8xf32, #tpu.memory_space<vmem>>, %arg2: memref<2x10x8xf32, #tpu.memory_space<vmem>>, %arg3: memref<2x10x8xf32, #tpu.memory_space<vmem>>, %arg4: memref<2x1x10xi32, #tpu.memory_space<vmem>>, %arg5: memref<2x1x8xf32, #tpu.memory_space<vmem>>) attributes {dimension_semantics = [#tpu.dimension_semantics<parallel>], iteration_bounds = array<i64: 1>, scalar_prefetch = 0 : i64, scratch_operands = 0 : i64, tpu.core_type = #tpu.core_type<tc>, window_params = [{transform_indices = @transform_0, window_bounds = array<i64: 2, 1, 8>}, {transform_indices = @transform_1, window_bounds = array<i64: 2, 10, 8>}, {transform_indices = @transform_2, window_bounds = array<i64: 2, 10, 8>}, {transform_indices = @transform_3, window_bounds = array<i64: 2, 1, 10>}, {transform_indices = @transform_4, window_bounds = array<i64: 2, 1, 8>}]} {
    %c0 = arith.constant 0 : index
    %c0_0 = arith.constant 0 : index
    %c0_1 = arith.constant 0 : index
    %0 = vector.load %arg1[%c0, %c0_0, %c0_1] : memref<2x1x8xf32, #tpu.memory_space<vmem>>, vector<2x1x8xf32>
    %c0_2 = arith.constant 0 : index
    %c0_3 = arith.constant 0 : index
    %c0_4 = arith.constant 0 : index
    %1 = vector.load %arg2[%c0_2, %c0_3, %c0_4] : memref<2x10x8xf32, #tpu.memory_space<vmem>>, vector<2x10x8xf32>
    %c0_5 = arith.constant 0 : index
    %c0_6 = arith.constant 0 : index
    %c0_7 = arith.constant 0 : index
    %2 = vector.load %arg3[%c0_5, %c0_6, %c0_7] : memref<2x10x8xf32, #tpu.memory_space<vmem>>, vector<2x10x8xf32>
    "tpu.trace_start"() <{level = 10 : i32, message = "bqd,bkd->bqk"}> : () -> ()
    %cst = arith.constant dense<0.000000e+00> : vector<2x1x10xf32>
    %3 = tpu.matmul %0, %1, %cst {dimension_numbers = #tpu.dot_dimension_numbers<[2], [2], [1], [1], [0, 0, 0, 1, 1, 1], [0], [0]>} : vector<2x1x8xf32>, vector<2x10x8xf32>, vector<2x1x10xf32> -> vector<2x1x10xf32>
    "tpu.trace_stop"() : () -> ()
    %cst_8 = arith.constant 1.000000e+01 : f32
    %4 = vector.broadcast %cst_8 : f32 to vector<2x1x10xf32>
    %5 = arith.mulf %3, %4 : vector<2x1x10xf32>
    %cst_9 = arith.constant dense<0xFF800000> : vector<2x1xf32>
    %6 = vector.multi_reduction <maximumf>, %5, %cst_9 [2] : vector<2x1x10xf32> to vector<2x1xf32>
    %7 = vector.shape_cast %6 : vector<2x1xf32> to vector<2x1x1xf32>
    %8 = vector.broadcast %7 : vector<2x1x1xf32> to vector<2x1x10xf32>
    %9 = arith.subf %5, %8 : vector<2x1x10xf32>
    %10 = math.exp %9 : vector<2x1x10xf32>
    %cst_10 = arith.constant dense<0.000000e+00> : vector<2x1xf32>
    %11 = vector.multi_reduction <add>, %10, %cst_10 [2] : vector<2x1x10xf32> to vector<2x1xf32>
    %12 = vector.shape_cast %11 : vector<2x1xf32> to vector<2x1x1xf32>
    %13 = vector.broadcast %12 : vector<2x1x1xf32> to vector<2x1x10xf32>
    %14 = arith.divf %10, %13 : vector<2x1x10xf32>
    %c0_11 = arith.constant 0 : index
    %c0_12 = arith.constant 0 : index
    %c0_13 = arith.constant 0 : index
    %15 = vector.load %arg4[%c0_11, %c0_12, %c0_13] : memref<2x1x10xi32, #tpu.memory_space<vmem>>, vector<2x1x10xi32>
    %c16777216_i32 = arith.constant 16777216 : i32
    %16 = vector.broadcast %c16777216_i32 : i32 to vector<2x1x10xi32>
    %17 = arith.cmpi sge, %15, %16 : vector<2x1x10xi32>
    %cst_14 = arith.constant 0.000000e+00 : f32
    %18 = vector.broadcast %cst_14 : f32 to vector<2x1x10xf32>
    %19 = arith.mulf %14, %18 : vector<2x1x10xf32>
    %cst_15 = arith.constant 0.000000e+00 : f32
    %20 = vector.broadcast %cst_15 : f32 to vector<2x1x10xf32>
    %21 = arith.select %17, %19, %20 : vector<2x1x10xi1>, vector<2x1x10xf32>
    "tpu.trace_start"() <{level = 10 : i32, message = "bqk,bkd->bqd"}> : () -> ()
    %cst_16 = arith.constant dense<0.000000e+00> : vector<2x1x8xf32>
    %22 = tpu.matmul %21, %2, %cst_16 {dimension_numbers = #tpu.dot_dimension_numbers<[2], [1], [1], [2], [0, 0, 0, 1, 1, 2], [0], [0]>} : vector<2x1x10xf32>, vector<2x10x8xf32>, vector<2x1x8xf32> -> vector<2x1x8xf32>
    "tpu.trace_stop"() : () -> ()
    %c0_17 = arith.constant 0 : index
    %c0_18 = arith.constant 0 : index
    %c0_19 = arith.constant 0 : index
    %23 = vector.load %arg5[%c0_17, %c0_18, %c0_19] : memref<2x1x8xf32, #tpu.memory_space<vmem>>, vector<2x1x8xf32>
    tpu.vector_store %arg5[%c0_17, %c0_18, %c0_19], %22 {strides = array<i32>} : memref<2x1x8xf32, #tpu.memory_space<vmem>>, vector<2x1x8xf32>,
    return
  }
  func.func @transform_0(%arg0: i32) -> (i32, i32, i32) {
    %c0_i32 = arith.constant 0 : i32
    %c0_i32_0 = arith.constant 0 : i32
    %c0_i32_1 = arith.constant 0 : i32
    return %arg0, %c0_i32, %c0_i32_0 : i32, i32, i32
  }
  func.func @transform_1(%arg0: i32) -> (i32, i32, i32) {
    %c0_i32 = arith.constant 0 : i32
    %c0_i32_0 = arith.constant 0 : i32
    %c0_i32_1 = arith.constant 0 : i32
    return %arg0, %c0_i32, %c0_i32_0 : i32, i32, i32
  }
  func.func @transform_2(%arg0: i32) -> (i32, i32, i32) {
    %c0_i32 = arith.constant 0 : i32
    %c0_i32_0 = arith.constant 0 : i32
    %c0_i32_1 = arith.constant 0 : i32
    return %arg0, %c0_i32, %c0_i32_0 : i32, i32, i32
  }
  func.func @transform_3(%arg0: i32) -> (i32, i32, i32) {
    %c0_i32 = arith.constant 0 : i32
    %c0_i32_0 = arith.constant 0 : i32
    %c0_i32_1 = arith.constant 0 : i32
    return %arg0, %c0_i32, %c0_i32_0 : i32, i32, i32
  }
  func.func @transform_4(%arg0: i32) -> (i32, i32, i32) {
    %c0_i32 = arith.constant 0 : i32
    %c0_i32_0 = arith.constant 0 : i32
    %c0_i32_1 = arith.constant 0 : i32
    return %arg0, %c0_i32, %c0_i32_0 : i32, i32, i32
  }
}

</mosaic_0001>

<bundles_post_ra>
// kernel: tpu_custom_call.1
= control target key start
LH: loop header
LB: loop body
LE: loop exit
PB: predicated region body
PF: predicated region fallthrough
CT: control target
= control target key end

     0   :  { %vm28_vm0 = vcmask 64512   ;;  %v498_v3 = vmov 0.0|0.0   ;;  %vm499_vm2 = vmmov 0   ;;  %v500_v7 = vmov 0.0   ;;  %s586_s0 = inlined_call_operand.vmem [shape: f32[2,1,8], index: 0, kind: input, shape index: {}]   ;;  %s587_s1 = inlined_call_operand.vmem [shape: f32[2,10,8], index: 1, kind: input, shape index: {}]   ;;  %s588_s2 = inlined_call_operand.vmem [shape: f32[2,10,8], index: 2, kind: input, shape index: {}]   ;;  %s589_s3 = inlined_call_operand.vmem [shape: s32[2,1,10], index: 3, kind: input, shape index: {}]   ;;  %s590_s4 = inlined_call_operand.hbm [shape: f32[2,1,8], index: 4, kind: output, shape index: {}]  }
   0x1   :  { %v20_v0 = vld [vmem:[%s587_s1] sm:$0xff]  ;;  %v21_v1 = vld [vmem:[%s587_s1 + $0x8] sm:$0x3]  ;;  %v22_v2 = vld [vmem:[%s587_s1 + $0x10] sm:$0xff]  ;;  %443 = vmatprep.subr.bf16.mxu0 %v498_v3  ;;  %447 = vmatprep.subr.bf16.mxu1 %v498_v3 }
   0x2   :  { %v444_v4 = vpack.c.bf16 %v21_v1, %v20_v0  ;;  %vm445_vm1 = vmpackc.low %vm28_vm0, %vm28_vm0  ;;  %v23_v5 = vld [vmem:[%s587_s1 + $0x18] sm:$0x3]  ;;  %419 = vmatprep.mubr.msk.f32.mxu0 %vm499_vm2, %v500_v7  ;;  %426 = vmatprep.mubr.msk.f32.mxu1 %vm499_vm2, %v500_v7 }
   0x3   :  { %v448_v6 = vpack.c.bf16 %v23_v5, %v22_v2 }
   0x4   :  { %9 = vsyncpa [#allocation3], 0  ;;  %446 = vmatpush3.bf16.xpose.msk.msra.mxu0 %vm445_vm1, %v444_v4  ;;  %v18_v8 = vld [vmem:[%s586_s0] sm:$0x1]  ;;  %v19_v9 = vld [vmem:[%s586_s0 + $0x1] sm:$0x1] }
   0x5   :  { %450 = vmatpush3.bf16.xpose.msk.msra.mxu1 %vm445_vm1, %v448_v6  ;;  %451 = vmatprep.subr.bf16.mxu0 %v498_v3  ;;  %vm189_vm3 = vcmask 73728   ;;  %v24_v28 = vld [vmem:[%s588_s2] sm:$0xff]  ;;  %v25_v29 = vld [vmem:[%s588_s2 + $0x8] sm:$0x3]  ;;  %vm224_vm4 = vcmask 1041408   ;;  %vm501_vm5 = vmmov 1  }
   0x6   :  { %455 = vmatprep.subr.bf16.mxu1 %v498_v3  ;;  %v452_v30 = vpack.c.bf16 %v25_v29, %v24_v28  ;;  %vm453_vm6 = vmpackc.low %vm224_vm4, %vm501_vm5  ;;  %v26_v31 = vld [vmem:[%s588_s2 + $0x10] sm:$0xff]  ;;  %v27_v32 = vld [vmem:[%s588_s2 + $0x18] sm:$0x3]  ;;  %vm220_vm8 = vcmask 80896   ;;  %vm374_vm10 = vcmask 57344   ;;  %s502_s2 = smov [#allocation2]  }
   0x7   :  { %v456_v33 = vpack.c.bf16 %v27_v32, %v26_v31  ;;  %v212_v36 = vld [vmem:[%s589_s3] sm:$0x1]  ;;  %v213_v40 = vld [vmem:[%s589_s3 + $0x1] sm:$0x1]  ;;  %s382_s11 = sshll.u32 %s502_s2, 4  ;;  %s383_s11 = int_to_ptr.vmem [resolvable:$true] %s382_s11 }
   0x8   :  { %vm214_vm7 = vcmp.ge.s32.totalorder %v212_v36, 16777216  ;;  %vm215_vm9 = vcmp.ge.s32.totalorder %v213_v40, 16777216  ;;  %s474_s12 = scalar_lea.vmem %s383_s11, 32  ;;  %p479_p1 = scmp.lt.s32.totalorder %s383_s11, %s383_s11 }
   0x9   :  { %p475_p0 = scmp.ne.s32.totalorder %s383_s11, %s474_s12  ;;  %p480_p2 = scmp.lt.s32.totalorder %s474_s12, %s474_s12 }
   0xb   :  { %420 = vmatmul.mubr.msk.f32.vlgmr.msra.gmra.mrb[0].mxu0 %vm28_vm0, %v18_v8  ;;  %p481_p3 = por %p480_p2, %p479_p1 }
   0xc   :  { %427 = vmatmul.mubr.msk.f32.vlgmr.msra.gmra.mrb[0].mxu1 %vm28_vm0, %v19_v9  ;;  %433 = vmatprep.mubr.msk.f32.mxu0 %vm499_vm2, %v500_v7 }
   0xd   :  { %440 = vmatprep.mubr.msk.f32.mxu1 %vm499_vm2, %v500_v7  ;;  %454 = vmatpush3.bf16.msk.msra.mxu0 %vm453_vm6, %v452_v30  ;;  %p482_p4 = pnand %p481_p3, %p475_p0 }
   0xe   :  { %458 = vmatpush3.bf16.msk.msra.mxu1 %vm453_vm6, %v456_v33 }
  0xde   :  { %v104_v10 = vpop.f32.mrb[0].mxu0 }
  0xdf   :  { %v187_v11 = vmul.f32 10.0, %v104_v10  ;;  %v421_v12 = vpop.f32.mrb[1].mxu0  ;;  %v183_v13 = vpop.f32.mrb[0].mxu1 }
  0xe0   :  { %v188_v14 = vmul.f32 10.0, %v183_v13  ;;  %v428_v15 = vpop.f32.mrb[1].mxu1 }
  0xe1   :  { %v190_v16 = vsel %vm189_vm3, %v187_v11, -inf }
  0xe2   :  { %191 = vmax.xlane.f32.xlu0 %v190_v16  ;;  %v193_v17 = vsel %vm189_vm3, %v188_v14, -inf }
  0xe6   :  { %194 = vmax.xlane.f32.xlu0 %v193_v17 }
 0x16f   :  { %v192_v18 = vpop.xlane.xlu0 %191 }
 0x170   :  { %v196_v19 = vsub.f32 %v187_v11, %v192_v18 }
 0x172   :  { %v198_v20 = vmul.f32 1.442695, %v196_v19 }
 0x173   :  { %v195_v21 = vpop.xlane.xlu0 %194 }
 0x174   :  { %466 = vpow2.f32 %v198_v20  ;;  %v197_v22 = vsub.f32 %v188_v14, %v195_v21 }
 0x176   :  { %v200_v23 = vmul.f32 1.442695, %v197_v22 }
 0x178   :  { %468 = vpow2.f32 %v200_v23 }
 0x17e   :  { %v467_v24 = vpop.eup %466 }
 0x17f   :  { %v202_v25 = vsel %vm189_vm3, %v467_v24, 0.0 }
 0x180   :  { %203 = vadd.xlane.f32.xlu1 %v202_v25 }
 0x182   :  { %v469_v26 = vpop.eup %468 }
 0x183   :  { %v205_v27 = vsel %vm189_vm3, %v469_v26, 0.0 }
 0x184   :  { %206 = vadd.xlane.f32.xlu1 %v205_v27 }
 0x20d   :  { %v204_v34 = vpop.xlane.xlu1 %203 }
 0x20e   :  { %470 = vrcp.f32 %v204_v34 }
 0x211   :  { %v207_v35 = vpop.xlane.xlu1 %206 }
 0x212   :  { %472 = vrcp.f32 %v207_v35 }
 0x218   :  { %v471_v37 = vpop.eup %470 }
 0x219   :  { %v209_v38 = vmul.f32 %v471_v37, %v467_v24 }
 0x21b   :  { %v216_v39 = vmul.f32 0.0, %v209_v38 }
 0x21c   :  { %v473_v41 = vpop.eup %472 }
 0x21d   :  { %v218_v42 = vsel %vm214_vm7, %v216_v39, 0.0  ;;  %v211_v43 = vmul.f32 %v473_v41, %v469_v26 }
 0x21e   :  { %434 = vmatmul.mubr.msk.f32.vlgmr.msra.gmra.mrb[2].mxu0 %vm220_vm8, %v218_v42 }
 0x21f   :  { %v217_v44 = vmul.f32 0.0, %v211_v43 }
 0x221   :  { %v219_v45 = vsel %vm215_vm9, %v217_v44, 0.0 }
 0x222   :  { %441 = vmatmul.mubr.msk.f32.vlgmr.msra.gmra.mrb[2].mxu1 %vm220_vm8, %v219_v45 }
 0x2f1   :  { %v294_v46 = vpop.f32.mrb[2].mxu0 }
 0x2f2   :  { %375 = vst.msk [vmem:[#allocation2] sm:$0x1] %vm374_vm10, %v294_v46  ;;  %v435_v47 = vpop.f32.mrb[3].mxu0 }
 0x2f5   :  { %v370_v48 = vpop.f32.mrb[2].mxu1 }
 0x2f6   :  { %376 = vst.msk [vmem:[#allocation2 + $0x1] sm:$0x1] %vm374_vm10, %v370_v48  ;;  %v442_v49 = vpop.f32.mrb[3].mxu1 }
 0x2f7   :  { %485 = shalt.err (!%p482_p4)
}
 0x2f8   :  { %s486_s14 = scalar_lea.hbm %s590_s4, 32 }
 0x2f9   :  { %p487_p5 = scmp.ne.s32.totalorder %s590_s4, %s486_s14  ;;  %p490_p6 = scmp.lt.u32.totalorder %s486_s14, %s590_s4 }
 0x2fb   :  { %p492_p7 = pnand %p490_p6, %p487_p5 }
 0x2fd   :  { %495 = shalt.err (!%p492_p7)
}
 0x2fe   :  { %s503_s19 = smov 16   ;;  %s504_s20 = smov 1  }
 0x2ff   :  { %388 = dma.vmem_to_hbm [thread:$0]  %s383_s11, 32, %s590_s4, [#allocation3], %s503_s19, %s503_s19, %s504_s20  }
 0x300   :  { %496 = dma.done.wait [#allocation3], 32  }
 0x301   :  { %497 = vsyncadd [#allocation3], 4294967264 }
 0x302   :  { %392 = vsyncpa [#allocation3], 1 }

</bundles_post_ra>
